<compile_context>
chip_gen: v7x
topology: tpu7x:2x2x1
jax: 0.10.0
libtpu: 0.0.40
codegen_flags: <defaults>
</compile_context>

<pallas_src>
import functools

import jax
import jax.numpy as jnp
from jax.experimental import pallas as pl
from jax.experimental.pallas import tpu as pltpu


def _sigmoid(a):
    # sigmoid(a) == 0.5 * tanh(0.5 * a) + 0.5  -> single EUP op per element.
    return 0.5 * jnp.tanh(0.5 * a) + 0.5


def _gru_kernel_fused(x_ref, y_ref, w_ref, bz_ref, o_ref, *, d, matmul_dtype,
                      precision):
    """Single K=2D matmul: [y|x] @ [[Wr|Wz|Wg|0],[Ur|Uz|0|Ug]] (v6e/v7x MXU)."""
    x = x_ref[...]
    y = y_ref[...]
    # Lane-dim concat at a 128-aligned boundary: no relayout.
    yx = jnp.concatenate([y, x], axis=1).astype(matmul_dtype)        # (tm, 2D)
    res = jnp.dot(yx, w_ref[...], preferred_element_type=jnp.float32,
                  precision=precision)                               # (tm, 4D)
    # 128-aligned column blocks: [Wr*y+Ur*x | Wz*y+Uz*x | Wg*y | Ug*x]
    r = _sigmoid(res[:, 0:d])
    z = _sigmoid(res[:, d:2 * d] + bz_ref[...])       # bz = Uz bias - bg
    h = jnp.tanh(res[:, 2 * d:3 * d] + r * res[:, 3 * d:4 * d])
    # g = (1 - z) * x + z * h == x + z * (h - x)
    o_ref[...] = (x + z * (h - x)).astype(o_ref.dtype)


def _gru_kernel_split(x_ref, y_ref, wcat_ref, ucat_ref, bz_ref, o_ref, *, d,
                      matmul_dtype, precision):
    """Two K=D matmuls (v5e: 128-wide MXU is already full at K=128)."""
    x = x_ref[...]
    y = y_ref[...]
    yw = jnp.dot(y.astype(matmul_dtype), wcat_ref[...],
                 preferred_element_type=jnp.float32, precision=precision)
    xu = jnp.dot(x.astype(matmul_dtype), ucat_ref[...],
                 preferred_element_type=jnp.float32, precision=precision)
    r = _sigmoid(yw[:, 0:d] + xu[:, 0:d])
    z = _sigmoid(yw[:, d:2 * d] + xu[:, d:2 * d] + bz_ref[...])
    h = jnp.tanh(yw[:, 2 * d:3 * d] + r * xu[:, 2 * d:3 * d])
    o_ref[...] = (x + z * (h - x)).astype(o_ref.dtype)


def _choose_tm(n_rows, tm, min_grid_steps):
    """8-aligned row tile, capped to give >= min_grid_steps grid steps (v7x)."""
    n8 = ((n_rows + 7) // 8) * 8
    tm = min(tm, n8)
    if min_grid_steps > 1:
        per_step = -(-n_rows // min_grid_steps)          # cdiv
        tm = min(tm, ((per_step + 7) // 8) * 8)
    return max(8, tm)


def gru_gating(x, y, params, *, bg=0.1, tm=1024, matmul_dtype=jnp.bfloat16,
               precision=None, fuse_dots=None, min_grid_steps=2):
    """GRU gate: x, y (N, D) -> (N, D).  params: Wr,Ur,Wz,Uz,Uz_b,Wg,Ug."""
    N, D = x.shape
    assert y.shape == (N, D)
    assert D % 128 == 0, "d_input must be a multiple of 128 (lane-aligned cols)"

    if fuse_dots is None:
        # 256-wide MXU (v6e/v7x+): fuse to K=2D. 128-wide MXU (<= v5): split.
        kind = jax.devices()[0].device_kind.lower()
        fuse_dots = not any(t in kind for t in ("v2", "v3", "v4", "v5"))

    tm = _choose_tm(N, tm, min_grid_steps)
    grid = (pl.cdiv(N, tm),)

    # Fold -bg into the Uz bias once (constant-folded under jit).
    bz = (params["Uz_b"].reshape(1, D) - bg).astype(jnp.float32)

    row_spec = pl.BlockSpec((tm, D), lambda i: (i, 0))

    # Weights / bias are grid-invariant: single-buffer them.
    def resident(shape):
        return pl.BlockSpec(shape, lambda i: (0, 0),
                            pipeline_mode=pl.Buffered(1))

    bias_spec = resident((1, D))

    if fuse_dots:
        zero = jnp.zeros((D, D), jnp.float32)
        w2 = jnp.concatenate(
            [jnp.concatenate([params["Wr"], params["Wz"], params["Wg"], zero], axis=1),
             jnp.concatenate([params["Ur"], params["Uz"], zero, params["Ug"]], axis=1)],
            axis=0).astype(matmul_dtype)                              # (2D, 4D)
        kernel = functools.partial(_gru_kernel_fused, d=D,
                                   matmul_dtype=matmul_dtype, precision=precision)
        weight_inputs = (w2,)
        weight_specs = [resident((2 * D, 4 * D))]
    else:
        w_cat = jnp.concatenate([params["Wr"], params["Wz"], params["Wg"]],
                                axis=1).astype(matmul_dtype)          # (D, 3D)
        u_cat = jnp.concatenate([params["Ur"], params["Uz"], params["Ug"]],
                                axis=1).astype(matmul_dtype)          # (D, 3D)
        kernel = functools.partial(_gru_kernel_split, d=D,
                                   matmul_dtype=matmul_dtype, precision=precision)
        weight_inputs = (w_cat, u_cat)
        weight_specs = [resident((D, 3 * D)), resident((D, 3 * D))]

    return pl.pallas_call(
        kernel,
        out_shape=jax.ShapeDtypeStruct((N, D), x.dtype),
        grid_spec=pltpu.PrefetchScalarGridSpec(
            num_scalar_prefetch=0,
            grid=grid,
            in_specs=[row_spec, row_spec] + weight_specs + [bias_spec],
            out_specs=row_spec,
        ),
        compiler_params=pltpu.CompilerParams(
            dimension_semantics=("parallel",),
            vmem_limit_bytes=32 * 1024 * 1024,
        ),
    )(x, y, *weight_inputs, bz)


def _reference(x, y, params, bg, matmul_dtype=jnp.float32, precision=None):
    def mm(a, w):
        return jnp.dot(a.astype(matmul_dtype), w.astype(matmul_dtype),
                       preferred_element_type=jnp.float32, precision=precision)
    r = jax.nn.sigmoid(mm(y, params["Wr"]) + mm(x, params["Ur"]))
    z = jax.nn.sigmoid(mm(y, params["Wz"]) + mm(x, params["Uz"])
                       + params["Uz_b"] - bg)
    h = jnp.tanh(mm(y, params["Wg"]) + r * mm(x, params["Ug"]))
    return (1.0 - z) * x + z * h


if __name__ == "__main__":
    batch, seq, d_input = 2, 8, 128
    bg = 0.1

    key = jax.random.PRNGKey(0)
    keys = jax.random.split(key, 9)

    scale = 1.0 / jnp.sqrt(jnp.float32(d_input))
    params = {
        "Wr": jax.random.normal(keys[0], (d_input, d_input), jnp.float32) * scale,
        "Ur": jax.random.normal(keys[1], (d_input, d_input), jnp.float32) * scale,
        "Wz": jax.random.normal(keys[2], (d_input, d_input), jnp.float32) * scale,
        "Uz": jax.random.normal(keys[3], (d_input, d_input), jnp.float32) * scale,
        "Uz_b": jax.random.normal(keys[4], (1, d_input), jnp.float32) * scale,
        "Wg": jax.random.normal(keys[5], (d_input, d_input), jnp.float32) * scale,
        "Ug": jax.random.normal(keys[6], (d_input, d_input), jnp.float32) * scale,
    }

    x = jax.random.normal(keys[7], (batch, seq, d_input), jnp.float32)
    y = jax.random.normal(keys[8], (batch, seq, d_input), jnp.float32)

    # Flatten leading dims into one row axis (tokens, features).
    x2 = x.reshape(batch * seq, d_input)
    y2 = y.reshape(batch * seq, d_input)

    # 1) Default fast path: bf16 matmul operands, layout auto-picked per MXU width.
    out_fast = gru_gating(x2, y2, params, bg=bg)
    jax.block_until_ready(out_fast)
    ref_bf16 = _reference(x2, y2, params, bg, matmul_dtype=jnp.bfloat16)
    assert jnp.allclose(out_fast, ref_bf16, atol=2e-3, rtol=2e-3), "bf16 path mismatch"

    # 2) f32 matmul operands, fused K=2D weight layout (v6e/v7x shape).
    ref_f32 = _reference(x2, y2, params, bg, matmul_dtype=jnp.float32)
    out_f32_fused = gru_gating(x2, y2, params, bg=bg,
                               matmul_dtype=jnp.float32, fuse_dots=True)
    assert jnp.allclose(out_f32_fused, ref_f32, atol=1e-4, rtol=1e-4), "f32 fused mismatch"

    # 3) f32 matmul operands, split two-dot layout (v5e shape).
    out_f32_split = gru_gating(x2, y2, params, bg=bg,
                               matmul_dtype=jnp.float32, fuse_dots=False)
    assert jnp.allclose(out_f32_split, ref_f32, atol=1e-4, rtol=1e-4), "f32 split mismatch"

    out = out_fast.reshape(batch, seq, d_input)
    jax.block_until_ready(out)
    print("KERNEL_OK")
</pallas_src>

<mosaic_0001>
module attributes {stable_mosaic.version = 11 : i64} {
  func.func @_gru_kernel_fused(%arg0: i32, %arg1: memref<8x128xf32, #tpu.memory_space<vmem>>, %arg2: memref<8x128xf32, #tpu.memory_space<vmem>>, %arg3: memref<256x512xbf16, #tpu.memory_space<vmem>>, %arg4: memref<1x128xf32, #tpu.memory_space<vmem>>, %arg5: memref<8x128xf32, #tpu.memory_space<vmem>>) attributes {dimension_semantics = [#tpu.dimension_semantics<parallel>], iteration_bounds = array<i64: 2>, scalar_prefetch = 0 : i64, scratch_operands = 0 : i64, tpu.core_type = #tpu.core_type<tc>, window_params = [{transform_indices = @transform_0, window_bounds = array<i64: 8, 128>}, {transform_indices = @transform_1, window_bounds = array<i64: 8, 128>}, {pipeline_mode = #tpu.pipeline_mode<synchronous>, transform_indices = @transform_2, window_bounds = array<i64: 256, 512>}, {pipeline_mode = #tpu.pipeline_mode<synchronous>, transform_indices = @transform_3, window_bounds = array<i64: 1, 128>}, {transform_indices = @transform_4, window_bounds = array<i64: 8, 128>}]} {
    %c0 = arith.constant 0 : index
    %c0_0 = arith.constant 0 : index
    %0 = vector.load %arg1[%c0, %c0_0] : memref<8x128xf32, #tpu.memory_space<vmem>>, vector<8x128xf32>
    %c0_1 = arith.constant 0 : index
    %c0_2 = arith.constant 0 : index
    %1 = vector.load %arg2[%c0_1, %c0_2] : memref<8x128xf32, #tpu.memory_space<vmem>>, vector<8x128xf32>
    %2 = tpu.concatenate %1, %0 in 1 : vector<8x128xf32>, vector<8x128xf32> -> vector<8x256xf32>
    %3 = arith.truncf %2 : vector<8x256xf32> to vector<8x256xbf16>
    %c0_3 = arith.constant 0 : index
    %c0_4 = arith.constant 0 : index
    %4 = vector.load %arg3[%c0_3, %c0_4] : memref<256x512xbf16, #tpu.memory_space<vmem>>, vector<256x512xbf16>
    %cst = arith.constant dense<0.000000e+00> : vector<8x512xf32>
    %5 = tpu.matmul %3, %4, %cst {dimension_numbers = #tpu.dot_dimension_numbers<[1], [0], [0], [1], [0, 0, 1, 1], [], []>} : vector<8x256xbf16>, vector<256x512xbf16>, vector<8x512xf32> -> vector<8x512xf32>
    %6 = vector.extract_strided_slice %5 {offsets = [0, 0], sizes = [8, 128], strides = [1, 1]} : vector<8x512xf32> to vector<8x128xf32>
    %cst_5 = arith.constant 5.000000e-01 : f32
    %7 = vector.broadcast %cst_5 : f32 to vector<8x128xf32>
    %8 = arith.mulf %7, %6 : vector<8x128xf32>
    %9 = math.tanh %8 : vector<8x128xf32>
    %cst_6 = arith.constant 5.000000e-01 : f32
    %10 = vector.broadcast %cst_6 : f32 to vector<8x128xf32>
    %11 = arith.mulf %10, %9 : vector<8x128xf32>
    %cst_7 = arith.constant 5.000000e-01 : f32
    %12 = vector.broadcast %cst_7 : f32 to vector<8x128xf32>
    %13 = arith.addf %11, %12 : vector<8x128xf32>
    %14 = vector.extract_strided_slice %5 {offsets = [0, 128], sizes = [8, 128], strides = [1, 1]} : vector<8x512xf32> to vector<8x128xf32>
    %c0_8 = arith.constant 0 : index
    %c0_9 = arith.constant 0 : index
    %15 = vector.load %arg4[%c0_8, %c0_9] : memref<1x128xf32, #tpu.memory_space<vmem>>, vector<1x128xf32>
    %16 = vector.broadcast %15 : vector<1x128xf32> to vector<8x128xf32>
    %17 = arith.addf %14, %16 : vector<8x128xf32>
    %cst_10 = arith.constant 5.000000e-01 : f32
    %18 = vector.broadcast %cst_10 : f32 to vector<8x128xf32>
    %19 = arith.mulf %18, %17 : vector<8x128xf32>
    %20 = math.tanh %19 : vector<8x128xf32>
    %cst_11 = arith.constant 5.000000e-01 : f32
    %21 = vector.broadcast %cst_11 : f32 to vector<8x128xf32>
    %22 = arith.mulf %21, %20 : vector<8x128xf32>
    %cst_12 = arith.constant 5.000000e-01 : f32
    %23 = vector.broadcast %cst_12 : f32 to vector<8x128xf32>
    %24 = arith.addf %22, %23 : vector<8x128xf32>
    %25 = vector.extract_strided_slice %5 {offsets = [0, 256], sizes = [8, 128], strides = [1, 1]} : vector<8x512xf32> to vector<8x128xf32>
    %26 = vector.extract_strided_slice %5 {offsets = [0, 384], sizes = [8, 128], strides = [1, 1]} : vector<8x512xf32> to vector<8x128xf32>
    %27 = arith.mulf %13, %26 : vector<8x128xf32>
    %28 = arith.addf %25, %27 : vector<8x128xf32>
    %29 = math.tanh %28 : vector<8x128xf32>
    %30 = arith.subf %29, %0 : vector<8x128xf32>
    %31 = arith.mulf %24, %30 : vector<8x128xf32>
    %32 = arith.addf %0, %31 : vector<8x128xf32>
    %c0_13 = arith.constant 0 : index
    %c0_14 = arith.constant 0 : index
    %33 = vector.load %arg5[%c0_13, %c0_14] : memref<8x128xf32, #tpu.memory_space<vmem>>, vector<8x128xf32>
    tpu.vector_store %arg5[%c0_13, %c0_14], %32 {strides = array<i32>} : memref<8x128xf32, #tpu.memory_space<vmem>>, vector<8x128xf32>,
    return
  }
  func.func @transform_0(%arg0: i32) -> (i32, i32) {
    %c0_i32 = arith.constant 0 : i32
    %c0_i32_0 = arith.constant 0 : i32
    return %arg0, %c0_i32 : i32, i32
  }
  func.func @transform_1(%arg0: i32) -> (i32, i32) {
    %c0_i32 = arith.constant 0 : i32
    %c0_i32_0 = arith.constant 0 : i32
    return %arg0, %c0_i32 : i32, i32
  }
  func.func @transform_2(%arg0: i32) -> (i32, i32) {
    %c0_i32 = arith.constant 0 : i32
    %c0_i32_0 = arith.constant 0 : i32
    %c0_i32_1 = arith.constant 0 : i32
    return %c0_i32, %c0_i32_0 : i32, i32
  }
  func.func @transform_3(%arg0: i32) -> (i32, i32) {
    %c0_i32 = arith.constant 0 : i32
    %c0_i32_0 = arith.constant 0 : i32
    %c0_i32_1 = arith.constant 0 : i32
    return %c0_i32, %c0_i32_0 : i32, i32
  }
  func.func @transform_4(%arg0: i32) -> (i32, i32) {
    %c0_i32 = arith.constant 0 : i32
    %c0_i32_0 = arith.constant 0 : i32
    return %arg0, %c0_i32 : i32, i32
  }
}

</mosaic_0001>

<bundles_post_ra>
// kernel: tpu_custom_call.1
= control target key start
LH: loop header
LB: loop body
LE: loop exit
PB: predicated region body
PF: predicated region fallthrough
CT: control target
= control target key end

     0   :  { %s1564_s0 = inlined_call_operand.hbm [shape: f32[16,128], index: 0, kind: input, shape index: {}]   ;;  %s1565_s1 = inlined_call_operand.hbm [shape: f32[16,128], index: 1, kind: input, shape index: {}]   ;;  %s1566_s2 = inlined_call_operand.hbm [shape: bf16[256,512], index: 2, kind: input, shape index: {}]   ;;  %s1567_s3 = inlined_call_operand.vmem [shape: f32[1,128], index: 3, kind: input, shape index: {}]   ;;  %s1568_s4 = inlined_call_operand.hbm [shape: f32[16,128], index: 4, kind: output, shape index: {}]  }
   0x1   :  { %1573 = sst [smem:[#allocation13_spill]] %s1566_s2 }
   0x2   :  { %9 = vsyncpa [#allocation3], 0 }
   0x3   :  { %11 = vsyncpa [#allocation3 + $0x1], 0 }
   0x4   :  { %12 = vsyncpa [#allocation6], 0 }
   0x5   :  { %14 = vsyncpa [#allocation6 + $0x1], 0 }
   0x6   :  { %15 = vsyncpa [#allocation4], 0 }
   0x7   :  { %17 = vsyncpa [#allocation4 + $0x1], 0  ;;  %s1316_s15 = smov 0   ;;  %s1318_s16 = smov 0  }
   0x8   :  { %s1320_s17 = smov 0   ;;  %s1322_s18 = smov 0  }
   0x9 LB: > { %s1337_s19 = sadd.s32 4294967295, %s1283_s18   ;;  %s873_s20 = sadd.s32 4294967294, %s1283_s18   ;;  %s1283_s18 = sphi %s1322_s18, %s1592_s18   ;;  %s1279_s17 = sphi %s1320_s17, %s1591_s17   ;;  %s1275_s16 = sphi %s1318_s16, %s1590_s16   ;;  %s1271_s15 = sphi %s1316_s15, %s1589_s15  }
   0xa   : > { %p43_p0 = scmp.ne.s32.totalorder %s1275_s16, %s1271_s15  ;;  %p1569_p1 = scmp.eq.s32.totalorder %s1337_s19, 0 }
   0xb   : > { %p141_p3 = scmp.eq.s32.totalorder %s873_s20, 1  ;;  %p874_p5 = scmp.ge.s32.totalorder %s1283_s18, 1 }
   0xc   : > { %p1346_p4 = por %p1569_p1, %p43_p0  ;;  %p148_p7 = scmp.lt.s32.totalorder %s1283_s18, 3 }
   0xd   : > { %p1351_p6 = por %p141_p3, %p43_p0  ;;  %s1285_s24 = smov [#allocation7]  }
   0xe   : > { %s1574_s21 = scalar_select %p1346_p4, 1, 0 }
   0xf   : > { %s1575_s22 = scalar_select %p1351_p6, 1, 0 }
  0x10   : > { %p1356_p8 = pnand %p874_p5, %p148_p7  ;;  %s160_s25 = sshll.u32 %s1285_s24, 4  ;;  %s1360_s25 = int_to_ptr.vmem [resolvable:$true] %s160_s25 }
  0x11   : > { %s1372_s27 = sadd.s32 1, %s1283_s18   ;;  %s30_s28 = sadd.s32 1, %s1279_s17 }
  0x12   : > { %s1576_s23 = scalar_select %p1356_p8, 1, 0 }
  0x13   : > { %p965_p9 = pneg %p1356_p8  ;;  %s27_s29 = ssub.s32 %s1283_s18, %s1372_s27 }
  0x14   : > { %s1578_s2 = sld [smem:[#allocation13_spill]] }
  0x15   : > { %p1367_p11 = pnand %p965_p9, %p1569_p1 }
  0x17   : > { %p1123_p13 = pneg %p1367_p11 }
  0x1a   : > { %s1121_s6 = scalar_lea.hbm %s1578_s2, 8192 }
  0x1b   : > { %p1122_p12 = scmp.ne.s32.totalorder %s1578_s2, %s1121_s6  ;;  %p1128_p5 = scmp.lt.u32.totalorder %s1121_s6, %s1578_s2 }
  0x1d   : > { %p1124_p0 = pnand %p1123_p13, %p1122_p12 }
  0x1f   : > { %p1125_p3 = pneg %p1124_p0 }
  0x21   : > { %p1130_p7 = pnand %p1128_p5, %p1125_p3 }
  0x23   : > { %1133 = shalt.err (!%p1130_p7)
}
  0x24   : > { %s1134_s11 = scalar_lea.vmem %s1360_s25, 8192  ;;  %p1142_p2 = scmp.lt.s32.totalorder %s1360_s25, %s1360_s25 }
  0x25   : > { %p1135_p9 = scmp.ne.s32.totalorder %s1360_s25, %s1134_s11  ;;  %p1143_p6 = scmp.lt.s32.totalorder %s1134_s11, %s1134_s11 }
  0x27   : > { %p1137_p10 = pnand %p1135_p9, %p1123_p13  ;;  %p1144_p4 = por %p1143_p6, %p1142_p2 }
  0x29   : > { %p1138_p1 = pneg %p1137_p10 }
  0x2b   : > { %p1145_p8 = pnand %p1144_p4, %p1138_p1 }
  0x2d   : > { %1148 = shalt.err (!%p1145_p8)
}
  0x2e   : > { %s1286_s12 = smov 256   ;;  %s1287_s13 = smov 16  }
  0x2f   : > { %968 = dma.hbm_to_vmem [thread:$0]  (!%p1367_p11), %s1578_s2, 8192, %s1360_s25, [#allocation6], %s1286_s12, %s1286_s12, %s1287_s13  }
  0x30   : > { %p28_p2 = scmp.eq.s32.totalorder %s27_s29, 0  ;;  %p37_p1 = scmp.ne.s32.totalorder %s1279_s17, %s1275_s16 }
  0x31   : > { %p38_p4 = scmp.eq.s32.totalorder %s1283_s18, 0  ;;  %p981_p6 = scmp.lt.s32.totalorder %s1283_s18, 2 }
  0x32   : > { %s1403_s24 = scalar_select %p28_p2, %s1279_s17, %s30_s28  }
  0x33   : > { %p39_p8 = por %p38_p4, %p37_p1  ;;  %p1579_p10 = scmp.eq.s32.totalorder %s1337_s19, 1 }
  0x34   : > { %s177_s5 = sand.u32 1, %s1279_s17   ;;  %s878_s6 = sshll.u32 %s1283_s18, 7 }
  0x35   : > { %p1407_p12 = por %p1579_p10, %p37_p1  ;;  %s1413_s7 = sshll.u32 %s177_s5, 3 }
  0x36   : > { %s1418_s25 = scalar_lea.hbm %s1564_s0, %s878_s6  ;;  %s181_s28 = scalar_lea.vmem [#allocation2], %s1413_s7 }
  0x37   : > { %s1580_s30 = scalar_select %p1407_p12, 1, 0 }
  0x38   : > { %s188_s29 = sshll.u32 %s181_s28, 4  ;;  %p1421_p11 = pnand %p981_p6, %p39_p8  ;;  %s1425_s29 = int_to_ptr.vmem [resolvable:$true] %s188_s29 }
  0x39   : > { %s1430_s12 = scalar_lea.hbm %s1565_s1, %s878_s6  ;;  %s178_s13 = scalar_lea.sflag [#allocation3], %s177_s5 }
  0x3a   : > { %s1149_s14 = scalar_lea.hbm %s1418_s25, 128  ;;  %p1151_p0 = pneg %p1421_p11 }
  0x3b   : > { %p1150_p13 = scmp.ne.s32.totalorder %s1418_s25, %s1149_s14  ;;  %s1154_s8 = scalar_lea.hbm %s1564_s0, 256 }
  0x3c   : > { %p1155_p7 = scmp.lt.u32.totalorder %s1418_s25, %s1564_s0  ;;  %p1156_p9 = scmp.lt.u32.totalorder %s1154_s8, %s1149_s14 }
  0x3d   : > { %p1152_p3 = pnand %p1151_p0, %p1150_p13  ;;  %p1158_p1 = scmp.lt.u32.totalorder %s1149_s14, %s1418_s25 }
  0x3e   : > { %p1157_p2 = por %p1156_p9, %p1155_p7 }
  0x3f   : > { %p1153_p5 = pneg %p1152_p3 }
  0x40   : > { %p1159_p4 = por %p1158_p1, %p1157_p2 }
  0x42   : > { %p1160_p6 = pnand %p1159_p4, %p1153_p5 }
  0x44   : > { %1163 = shalt.err (!%p1160_p6)
}
  0x45   : > { %s1164_s5 = scalar_lea.vmem %s1425_s29, 128  ;;  %s1288_s6 = smov [#allocation2]  }
  0x46   : > { %p1165_p8 = scmp.ne.s32.totalorder %s1425_s29, %s1164_s5  ;;  %s1169_s10 = sshll.u32 %s1288_s6, 4  ;;  %s1170_s10 = int_to_ptr.vmem [resolvable:$false] %s1169_s10 }
  0x47   : > { %s1171_s2 = scalar_lea.vmem %s1170_s10, 256  ;;  %p1172_p3 = scmp.lt.s32.totalorder %s1425_s29, %s1170_s10 }
  0x48   : > { %p1167_p10 = pnand %p1165_p8, %p1151_p0  ;;  %p1173_p7 = scmp.lt.s32.totalorder %s1171_s2, %s1164_s5 }
  0x4a   : > { %p1168_p13 = pneg %p1167_p10  ;;  %p1174_p9 = por %p1173_p7, %p1172_p3 }
  0x4c   : > { %p1175_p2 = pnand %p1174_p9, %p1168_p13 }
  0x4e   : > { %1178 = shalt.err (!%p1175_p2)
}
  0x4f   : > { %972 = dma.hbm_to_vmem [thread:$0]  (!%p1421_p11), %s1418_s25, 128, %s1425_s29, %s178_s13  }
  0x50   : > { %s195_s11 = sand.u32 1, %s1283_s18   ;;  %s199_s14 = scalar_lea.vmem [#allocation5], %s1413_s7 }
  0x51   : > { %s206_s20 = sshll.u32 %s199_s14, 4  ;;  %s196_s26 = scalar_lea.sflag [#allocation6], %s195_s11  ;;  %s207_s20 = int_to_ptr.vmem [resolvable:$true] %s206_s20 }
  0x52   : > { %s1179_s8 = scalar_lea.hbm %s1430_s12, 128  ;;  %s1184_s6 = scalar_lea.hbm %s1565_s1, 256 }
  0x53   : > { %p1180_p5 = scmp.ne.s32.totalorder %s1430_s12, %s1179_s8  ;;  %p1185_p6 = scmp.lt.u32.totalorder %s1430_s12, %s1565_s1 }
  0x54   : > { %p1186_p8 = scmp.lt.u32.totalorder %s1184_s6, %s1179_s8  ;;  %p1188_p13 = scmp.lt.u32.totalorder %s1179_s8, %s1430_s12 }
  0x55   : > { %p1182_p1 = pnand %p1180_p5, %p1151_p0 }
  0x56   : > { %p1187_p10 = por %p1186_p8, %p1185_p6 }
  0x57   : > { %p1183_p4 = pneg %p1182_p1 }
  0x58   : > { %p1189_p3 = por %p1188_p13, %p1187_p10 }
  0x5a   : > { %p1190_p7 = pnand %p1189_p3, %p1183_p4 }
  0x5c   : > { %1193 = shalt.err (!%p1190_p7)
}
  0x5d   : > { %s1194_s7 = scalar_lea.vmem %s207_s20, 128  ;;  %s1289_s25 = smov [#allocation5]  }
  0x5e   : > { %p1195_p9 = scmp.ne.s32.totalorder %s207_s20, %s1194_s7  ;;  %s1199_s29 = sshll.u32 %s1289_s25, 4  ;;  %s1200_s29 = int_to_ptr.vmem [resolvable:$false] %s1199_s29 }
  0x5f   : > { %s1201_s13 = scalar_lea.vmem %s1200_s29, 256  ;;  %p1202_p1 = scmp.lt.s32.totalorder %s207_s20, %s1200_s29 }
  0x60   : > { %p1197_p2 = pnand %p1195_p9, %p1151_p0  ;;  %p1203_p12 = scmp.lt.s32.totalorder %s1201_s13, %s1194_s7 }
  0x62   : > { %p1198_p5 = pneg %p1197_p2  ;;  %p1204_p6 = por %p1203_p12, %p1202_p1 }
  0x64   : > { %p1205_p8 = pnand %p1204_p6, %p1198_p5 }
  0x66   : > { %1208 = shalt.err (!%p1205_p8)
}
  0x67   : > { %975 = dma.hbm_to_vmem [thread:$0]  (!%p1421_p11), %s1430_s12, 128, %s207_s20, %s196_s26  }
  0x68   : > { %p1582_p4 = scmp.ne.s32.totalorder %s1576_s23, 0 }
  0x69   : > { %s1481_s11 = sand.u32 (!%p1582_p4), 1, %s1275_s16   ;;  %p1583_p12 = scmp.ne.s32.totalorder (!%p1582_p4), %s1574_s21, 0 }
  0x6a   : > { %215 = sbr.rel (%p1582_p4) target bundleno = 449 (0x1c1), region = 36  ;;  %s1484_s14 = sshll.u32 (!%p1582_p4), %s1481_s11, 3 }
  0x6b   : > { %s218_s8 = scalar_lea.sflag (!%p1582_p4), [#allocation3], %s1481_s11  ;;  %s221_s28 = scalar_lea.vmem (!%p1582_p4), [#allocation2], %s1484_s14 }
  0x71   : > { %1254 = dma.done.wait (%p1583_p12), %s218_s8, 128  }
  0x72   : > { %1256 = vsyncadd (%p1583_p12), %s218_s8, 4294967168  ;;  %s226_s23 = sand.u32 1, %s1337_s19   ;;  %s230_s12 = scalar_lea.vmem [#allocation5], %s1484_s14 }
  0x73   : > { %s227_s9 = scalar_lea.sflag [#allocation6], %s226_s23 }
  0x74   : > { %1258 = dma.done.wait (%p1583_p12), %s227_s9, 128  }
  0x75   : > { %1260 = vsyncadd (%p1583_p12), %s227_s9, 4294967168  ;;  %p1584_p11 = scmp.eq.s32.totalorder %s1337_s19, 0 }
  0x77   : > { %1262 = dma.done.wait (%p1584_p11), [#allocation6], 8192   ;;  %p1585_p0 = pmov %p1584_p11 }
  0x78   : > { %v1019_v0 = vld [vmem:[#allocation7 + $0x4] ss:$16 sps:$4 sm:$0xff]   ;;  %v1021_v1 = vld [vmem:[#allocation7] ss:$16 sps:$4 sm:$0xff]   ;;  %v1031_v5 = vld [vmem:[#allocation7 + $0xc] ss:$16 sps:$4 sm:$0xff]  }
  0x79   : > { %1264 = vsyncadd (%p1585_p0), [#allocation6], 4294959104  ;;  %652 = vmatprep.subr.bf16.mxu0 %v1019_v0  ;;  %v1022_v2 = vld [vmem:[#allocation7 + $0x24] ss:$16 sps:$4 sm:$0xff]   ;;  %v1024_v3 = vld [vmem:[#allocation7 + $0x20] ss:$16 sps:$4 sm:$0xff]   ;;  %693 = vmatprep.subr.bf16.mxu1 %v1031_v5 }
  0x7a   : > { %653 = vmatpush1.bf16.msra.mxu0 %v1021_v1  ;;  %v1025_v4 = vld [vmem:[#allocation7 + $0x44] ss:$16 sps:$4 sm:$0xff]   ;;  %v1033_v6 = vld [vmem:[#allocation7 + $0x8] ss:$16 sps:$4 sm:$0xff]   ;;  %v1027_v7 = vld [vmem:[#allocation7 + $0x40] ss:$16 sps:$4 sm:$0xff]  }
  0x7b   : > { %654 = vmatprep.subr.bf16.mxu0 %v1022_v2  ;;  %v1028_v8 = vld [vmem:[#allocation7 + $0x64] ss:$16 sps:$4 sm:$0xff]   ;;  %v1037_v9 = vld [vmem:[#allocation7 + $0x2c] ss:$16 sps:$4 sm:$0xff]   ;;  %694 = vmatpush1.bf16.msra.mxu1 %v1033_v6  ;;  %v1039_v10 = vld [vmem:[#allocation7 + $0x28] ss:$16 sps:$4 sm:$0xff]  }
  0x7c   : > { %695 = vmatprep.subr.bf16.mxu1 %v1037_v9  ;;  %v1030_v11 = vld [vmem:[#allocation7 + $0x60] ss:$16 sps:$4 sm:$0xff]   ;;  %v1043_v12 = vld [vmem:[#allocation7 + $0x4c] ss:$16 sps:$4 sm:$0xff]   ;;  %v1034_v13 = vld [vmem:[#allocation7 + $0x84] ss:$16 sps:$4 sm:$0xff]  }
  0x7d   : > { %v1045_v14 = vld [vmem:[#allocation7 + $0x48] ss:$16 sps:$4 sm:$0xff]   ;;  %v1049_v15 = vld [vmem:[#allocation7 + $0x6c] ss:$16 sps:$4 sm:$0xff]   ;;  %v1036_v16 = vld [vmem:[#allocation7 + $0x80] ss:$16 sps:$4 sm:$0xff]  }
  0x7e   : > { %655 = vmatpush1.bf16.msra.mxu0 %v1024_v3  ;;  %v1040_v17 = vld [vmem:[#allocation7 + $0xa4] ss:$16 sps:$4 sm:$0xff]   ;;  %v1051_v18 = vld [vmem:[#allocation7 + $0x68] ss:$16 sps:$4 sm:$0xff]   ;;  %v1055_v19 = vld [vmem:[#allocation7 + $0x8c] ss:$16 sps:$4 sm:$0xff]  }
  0x7f   : > { %656 = vmatprep.subr.bf16.mxu0 %v1025_v4  ;;  %696 = vmatpush1.bf16.msra.mxu1 %v1039_v10  ;;  %v1042_v20 = vld [vmem:[#allocation7 + $0xa0] ss:$16 sps:$4 sm:$0xff]   ;;  %v1046_v21 = vld [vmem:[#allocation7 + $0xc4] ss:$16 sps:$4 sm:$0xff]   ;;  %v1057_v22 = vld [vmem:[#allocation7 + $0x88] ss:$16 sps:$4 sm:$0xff]  }
  0x80   : > { %697 = vmatprep.subr.bf16.mxu1 %v1043_v12  ;;  %v1061_v23 = vld [vmem:[#allocation7 + $0xac] ss:$16 sps:$4 sm:$0xff]   ;;  %v1048_v24 = vld [vmem:[#allocation7 + $0xc0] ss:$16 sps:$4 sm:$0xff]   ;;  %v1052_v25 = vld [vmem:[#allocation7 + $0xe4] ss:$16 sps:$4 sm:$0xff]  }
  0x81   : > { %v1063_v26 = vld [vmem:[#allocation7 + $0xa8] ss:$16 sps:$4 sm:$0xff]   ;;  %v1067_v27 = vld [vmem:[#allocation7 + $0xcc] ss:$16 sps:$4 sm:$0xff]   ;;  %v1054_v28 = vld [vmem:[#allocation7 + $0xe0] ss:$16 sps:$4 sm:$0xff]  }
  0x82   : > { %657 = vmatpush1.bf16.msra.mxu0 %v1027_v7  ;;  %v1058_v29 = vld [vmem:[#allocation7 + $0x104] ss:$16 sps:$4 sm:$0xff]   ;;  %v1069_v30 = vld [vmem:[#allocation7 + $0xc8] ss:$16 sps:$4 sm:$0xff]   ;;  %v1073_v31 = vld [vmem:[#allocation7 + $0xec] ss:$16 sps:$4 sm:$0xff]  }
  0x83   : > { %658 = vmatprep.subr.bf16.mxu0 %v1028_v8  ;;  %698 = vmatpush1.bf16.msra.mxu1 %v1045_v14  ;;  %v1060_v32 = vld [vmem:[#allocation7 + $0x100] ss:$16 sps:$4 sm:$0xff]   ;;  %v1064_v33 = vld [vmem:[#allocation7 + $0x124] ss:$16 sps:$4 sm:$0xff]   ;;  %v1075_v34 = vld [vmem:[#allocation7 + $0xe8] ss:$16 sps:$4 sm:$0xff]  }
  0x84   : > { %699 = vmatprep.subr.bf16.mxu1 %v1049_v15  ;;  %v1079_v35 = vld [vmem:[#allocation7 + $0x10c] ss:$16 sps:$4 sm:$0xff]   ;;  %v1066_v36 = vld [vmem:[#allocation7 + $0x120] ss:$16 sps:$4 sm:$0xff]   ;;  %v1070_v37 = vld [vmem:[#allocation7 + $0x144] ss:$16 sps:$4 sm:$0xff]  }
  0x85   : > { %v1081_v38 = vld [vmem:[#allocation7 + $0x108] ss:$16 sps:$4 sm:$0xff]   ;;  %v1085_v39 = vld [vmem:[#allocation7 + $0x12c] ss:$16 sps:$4 sm:$0xff]   ;;  %v1072_v41 = vld [vmem:[#allocation7 + $0x140] ss:$16 sps:$4 sm:$0xff]  }
  0x86   : > { %659 = vmatpush1.bf16.msra.mxu0 %v1030_v11  ;;  %v1504_v40 = vld [vmem:[%s221_s28] sm:$0xff]  ;;  %v265_v63 = vld [vmem:[%s230_s12] sm:$0xff]  ;;  %s952_s26 = sshll.u32 %s1337_s19, 7  ;;  %s263_s5 = scalar_lea.vmem [#allocation8], %s1484_s14 }
  0x87   : > { %660 = vmatprep.subr.bf16.mxu0 %v1034_v13  ;;  %700 = vmatpush1.bf16.msra.mxu1 %v1051_v18  ;;  %v267_v42 = vpack.c.bf16 %v1504_v40, %v1504_v40  ;;  %v1076_v43 = vld [vmem:[#allocation7 + $0x164] ss:$16 sps:$4 sm:$0xff]   ;;  %v1087_v44 = vld [vmem:[#allocation7 + $0x128] ss:$16 sps:$4 sm:$0xff]   ;;  %v1091_v45 = vld [vmem:[#allocation7 + $0x14c] ss:$16 sps:$4 sm:$0xff]   ;;  %v266_v1 = vpack.c.bf16 %v265_v63, %v265_v63  ;;  %s1520_s7 = scalar_lea.hbm %s1568_s4, %s952_s26 }
  0x88   : > { %701 = vmatprep.subr.bf16.mxu1 %v1055_v19  ;;  %v1078_v46 = vld [vmem:[#allocation7 + $0x160] ss:$16 sps:$4 sm:$0xff]   ;;  %v1082_v47 = vld [vmem:[#allocation7 + $0x184] ss:$16 sps:$4 sm:$0xff]   ;;  %v1093_v48 = vld [vmem:[#allocation7 + $0x148] ss:$16 sps:$4 sm:$0xff]  }
  0x89   : > { %684 = vmatprep.mubr.bf16.mxu0 %v267_v42  ;;  %725 = vmatprep.mubr.bf16.mxu1 %v267_v42  ;;  %v1097_v49 = vld [vmem:[#allocation7 + $0x16c] ss:$16 sps:$4 sm:$0xff]   ;;  %v1084_v50 = vld [vmem:[#allocation7 + $0x180] ss:$16 sps:$4 sm:$0xff]   ;;  %v1088_v51 = vld [vmem:[#allocation7 + $0x1a4] ss:$16 sps:$4 sm:$0xff]  }
  0x8a   : > { %661 = vmatpush1.bf16.msra.mxu0 %v1036_v16  ;;  %v1099_v52 = vld [vmem:[#allocation7 + $0x168] ss:$16 sps:$4 sm:$0xff]   ;;  %v1103_v53 = vld [vmem:[#allocation7 + $0x18c] ss:$16 sps:$4 sm:$0xff]   ;;  %v1090_v54 = vld [vmem:[#allocation7 + $0x1a0] ss:$16 sps:$4 sm:$0xff]  }
  0x8b   : > { %662 = vmatprep.subr.bf16.mxu0 %v1040_v17  ;;  %702 = vmatpush1.bf16.msra.mxu1 %v1057_v22  ;;  %v1094_v55 = vld [vmem:[#allocation7 + $0x1c4] ss:$16 sps:$4 sm:$0xff]   ;;  %v1105_v56 = vld [vmem:[#allocation7 + $0x188] ss:$16 sps:$4 sm:$0xff]   ;;  %v1106_v57 = vld [vmem:[#allocation7 + $0x1ac] ss:$16 sps:$4 sm:$0xff]  }
  0x8c   : > { %703 = vmatprep.subr.bf16.mxu1 %v1061_v23  ;;  %v1096_v58 = vld [vmem:[#allocation7 + $0x1c0] ss:$16 sps:$4 sm:$0xff]   ;;  %v1100_v59 = vld [vmem:[#allocation7 + $0x1e4] ss:$16 sps:$4 sm:$0xff]   ;;  %v1108_v60 = vld [vmem:[#allocation7 + $0x1a8] ss:$16 sps:$4 sm:$0xff]  }
  0x8d   : > { %v1109_v61 = vld [vmem:[#allocation7 + $0x1cc] ss:$16 sps:$4 sm:$0xff]   ;;  %v1102_v62 = vld [vmem:[#allocation7 + $0x1e0] ss:$16 sps:$4 sm:$0xff]   ;;  %v1111_v0 = vld [vmem:[#allocation7 + $0x1c8] ss:$16 sps:$4 sm:$0xff]  }
  0x8e   : > { %663 = vmatpush1.bf16.msra.mxu0 %v1042_v20  ;;  %v1112_v2 = vld [vmem:[#allocation7 + $0x1ec] ss:$16 sps:$4 sm:$0xff]   ;;  %v1114_v3 = vld [vmem:[#allocation7 + $0x1e8] ss:$16 sps:$4 sm:$0xff]   ;;  %v950_v9 = vld [vmem:[%s1567_s3] ss:$0 sm:$0xff] }
  0x8f   : > { %664 = vmatprep.subr.bf16.mxu0 %v1046_v21  ;;  %704 = vmatpush1.bf16.msra.mxu1 %v1063_v26  ;;  %s771_s6 = sshll.u32 %s263_s5, 4  ;;  %s758_s25 = scalar_lea.sflag [#allocation4], %s1481_s11  ;;  %s1522_s6 = int_to_ptr.vmem [resolvable:$true] %s771_s6 }
  0x90   : > { %705 = vmatprep.subr.bf16.mxu1 %v1067_v27  ;;  %s1209_s29 = scalar_lea.vmem %s1522_s6, 128  ;;  %p1586_p13 = scmp.ne.s32.totalorder %s1580_s30, 0 }
  0x91   : > { %p1210_p10 = scmp.ne.s32.totalorder %s1522_s6, %s1209_s29  ;;  %s1290_s19 = smov [#allocation8]  }
  0x92   : > { %665 = vmatpush1.bf16.msra.mxu0 %v1048_v24  ;;  %s1213_s13 = sshll.u32 %s1290_s19, 4  ;;  %s1214_s13 = int_to_ptr.vmem [resolvable:$false] %s1213_s13 }
  0x93   : > { %666 = vmatprep.subr.bf16.mxu0 %v1052_v25  ;;  %706 = vmatpush1.bf16.msra.mxu1 %v1069_v30  ;;  %p1211_p3 = pnand %p1210_p10, %p1586_p13  ;;  %s1215_s14 = scalar_lea.vmem %s1214_s13, 256 }
  0x94   : > { %707 = vmatprep.subr.bf16.mxu1 %v1073_v31  ;;  %p1216_p9 = scmp.lt.s32.totalorder %s1522_s6, %s1214_s13  ;;  %p1217_p2 = scmp.lt.s32.totalorder %s1215_s14, %s1209_s29 }
  0x95   : > { %p1212_p7 = pneg %p1211_p3 }
  0x96   : > { %667 = vmatpush1.bf16.msra.mxu0 %v1054_v28  ;;  %p1218_p5 = por %p1217_p2, %p1216_p9 }
  0x97   : > { %668 = vmatprep.subr.bf16.mxu0 %v1058_v29  ;;  %708 = vmatpush1.bf16.msra.mxu1 %v1075_v34 }
  0x98   : > { %709 = vmatprep.subr.bf16.mxu1 %v1079_v35  ;;  %p1219_p1 = pnand %p1218_p5, %p1212_p7 }
  0x9a   : > { %669 = vmatpush1.bf16.msra.mxu0 %v1060_v32 }
  0x9b   : > { %670 = vmatprep.subr.bf16.mxu0 %v1064_v33  ;;  %710 = vmatpush1.bf16.msra.mxu1 %v1081_v38 }
  0x9c   : > { %711 = vmatprep.subr.bf16.mxu1 %v1085_v39 }
  0x9e   : > { %671 = vmatpush1.bf16.msra.mxu0 %v1066_v36 }
  0x9f   : > { %672 = vmatprep.subr.bf16.mxu0 %v1070_v37  ;;  %712 = vmatpush1.bf16.msra.mxu1 %v1087_v44 }
  0xa0   : > { %713 = vmatprep.subr.bf16.mxu1 %v1091_v45 }
  0xa2   : > { %673 = vmatpush1.bf16.msra.mxu0 %v1072_v41 }
  0xa3   : > { %674 = vmatprep.subr.bf16.mxu0 %v1076_v43  ;;  %714 = vmatpush1.bf16.msra.mxu1 %v1093_v48 }
  0xa4   : > { %715 = vmatprep.subr.bf16.mxu1 %v1097_v49 }
  0xa6   : > { %675 = vmatpush1.bf16.msra.mxu0 %v1078_v46 }
  0xa7   : > { %676 = vmatprep.subr.bf16.mxu0 %v1082_v47  ;;  %716 = vmatpush1.bf16.msra.mxu1 %v1099_v52 }
  0xa8   : > { %717 = vmatprep.subr.bf16.mxu1 %v1103_v53 }
  0xaa   : > { %677 = vmatpush1.bf16.msra.mxu0 %v1084_v50 }
  0xab   : > { %678 = vmatprep.subr.bf16.mxu0 %v1088_v51  ;;  %718 = vmatpush1.bf16.msra.mxu1 %v1105_v56 }
  0xac   : > { %719 = vmatprep.subr.bf16.mxu1 %v1106_v57 }
  0xae   : > { %679 = vmatpush1.bf16.msra.mxu0 %v1090_v54 }
  0xaf   : > { %680 = vmatprep.subr.bf16.mxu0 %v1094_v55  ;;  %720 = vmatpush1.bf16.msra.mxu1 %v1108_v60 }
  0xb0   : > { %721 = vmatprep.subr.bf16.mxu1 %v1109_v61 }
  0xb2   : > { %681 = vmatpush1.bf16.msra.mxu0 %v1096_v58 }
  0xb3   : > { %682 = vmatprep.subr.bf16.mxu0 %v1100_v59  ;;  %722 = vmatpush1.bf16.msra.mxu1 %v1111_v0 }
  0xb4   : > { %723 = vmatprep.subr.bf16.mxu1 %v1112_v2 }
  0xb6   : > { %683 = vmatpush1.bf16.msra.mxu0 %v1102_v62 }
  0xb7   : > { %724 = vmatpush1.bf16.msra.mxu1 %v1114_v3 }
  0xb9   : > { %685 = vmatmul.mubr.bf16.vlgmr.msra.gmra.mrb[0].mxu0 %v266_v1 }
  0xba   : > { %726 = vmatmul.mubr.bf16.vlgmr.msra.gmra.mrb[0].mxu1 %v266_v1 }
 0x18c   : > { %v686_v4 = vpop.f32.mrb[0].mxu0 }
 0x18d   : > { %v734_v5 = vmul.f32 0.5, %v686_v4  ;;  %v688_v6 = vpop.f32.mrb[1].mxu0  ;;  %v727_v10 = vpop.f32.mrb[0].mxu1 }
 0x18e   : > { %v690_v7 = vpop.f32.mrb[2].mxu0  ;;  %v729_v11 = vpop.f32.mrb[1].mxu1  ;;  %v745_v12 = vadd.f32 %v950_v9, %v688_v6 }
 0x18f   : > { %1115 = vtanh.f32 %v734_v5  ;;  %v691_v8 = vpop.f32.mrb[3].mxu0  ;;  %v731_v13 = vpop.f32.mrb[2].mxu1 }
 0x190   : > { %v732_v14 = vpop.f32.mrb[3].mxu1  ;;  %v746_v15 = vmul.f32 0.5, %v745_v12 }
 0x192   : > { %1117 = vtanh.f32 %v746_v15 }
 0x199   : > { %v1116_v16 = vpop.eup %1115 }
 0x19a   : > { %v736_v17 = vmul.f32 0.5, %v1116_v16 }
 0x19c   : > { %v737_v18 = vadd.f32 0.5, %v736_v17  ;;  %v1118_v21 = vpop.eup %1117 }
 0x19d   : > { %v748_v22 = vmul.f32 0.5, %v1118_v21 }
 0x19e   : > { %v750_v19 = vmul.f32 %v737_v18, %v729_v11 }
 0x19f   : > { %v749_v24 = vadd.f32 0.5, %v748_v22 }
 0x1a0   : > { %v751_v20 = vadd.f32 %v750_v19, %v727_v10 }
 0x1a2   : > { %1119 = vtanh.f32 %v751_v20 }
 0x1ac   : > { %v1120_v23 = vpop.eup %1119 }
 0x1ad   : > { %v753_v25 = vsub.f32 %v1120_v23, %v1504_v40 }
 0x1af   : > { %v754_v26 = vmul.f32 %v753_v25, %v749_v24 }
 0x1b1   : > { %v755_v27 = vadd.f32 %v754_v26, %v1504_v40 }
 0x1b3   : > { %756 = vst [vmem:[%s263_s5] sm:$0xff] %v755_v27 }
 0x1b4   : > { %1222 = shalt.err (!%p1219_p1)
}
 0x1b5   : > { %s1223_s11 = scalar_lea.hbm %s1520_s7, 128  ;;  %s1227_s23 = scalar_lea.hbm %s1568_s4, 256 }
 0x1b6   : > { %p1224_p6 = scmp.ne.s32.totalorder %s1520_s7, %s1223_s11  ;;  %p1228_p12 = scmp.lt.u32.totalorder %s1520_s7, %s1568_s4 }
 0x1b7   : > { %p1229_p11 = scmp.lt.u32.totalorder %s1227_s23, %s1223_s11  ;;  %p1231_p10 = scmp.lt.u32.totalorder %s1223_s11, %s1520_s7 }
 0x1b8   : > { %p1225_p8 = pnand %p1224_p6, %p1586_p13 }
 0x1b9   : > { %p1230_p0 = por %p1229_p11, %p1228_p12 }
 0x1ba   : > { %p1226_p4 = pneg %p1225_p8 }
 0x1bb   : > { %p1232_p3 = por %p1231_p10, %p1230_p0 }
 0x1bd   : > { %p1233_p7 = pnand %p1232_p3, %p1226_p4 }
 0x1bf   : > { %1236 = shalt.err (!%p1233_p7)
}
 0x1c0   : > { %963 = dma.vmem_to_hbm [thread:$0]  (%p1586_p13), %s1522_s6, 128, %s1520_s7, %s758_s25  }
 0x1c1 PF: > { %s783_s21 = sand.u32 1, %s1271_s15   ;;  %p1587_p9 = scmp.ne.s32.totalorder %s1575_s22, 0 }
 0x1c2   : > { %p1588_p2 = scmp.ge.s32.totalorder %s1283_s18, 2  ;;  %s784_s20 = scalar_lea.sflag [#allocation4], %s783_s21 }
 0x1c4   : > { %p977_p5 = pnand %p1588_p2, %p1587_p9 }
 0x1c6   : > { %1266 = dma.done.wait (!%p977_p5), %s784_s20, 128  }
 0x1c7   : > { %1268 = vsyncadd (!%p977_p5), %s784_s20, 4294967168  ;;  %p20_p1 = scmp.ge.s32.totalorder %s1372_s27, 4   ;;  %s1589_s15 = smov %s1275_s16 }
 0x1c8   : > { %s1590_s16 = smov %s1279_s17  ;;  %s1591_s17 = smov %s1403_s24 }
 0x1c9   : > { %s1592_s18 = smov %s1372_s27  ;;  %22 = sbr.rel (!%p20_p1) target bundleno = 9 (0x9), region = 98 }
 0x1d0   :  { %789 = vsyncpa [#allocation3], 1 }
 0x1d1   :  { %791 = vsyncpa [#allocation3 + $0x1], 1 }
 0x1d2   :  { %792 = vsyncpa [#allocation6], 1 }
 0x1d3   :  { %794 = vsyncpa [#allocation6 + $0x1], 1 }
 0x1d4   :  { %795 = vsyncpa [#allocation4], 1 }
 0x1d5   :  { %797 = vsyncpa [#allocation4 + $0x1], 1 }

</bundles_post_ra>
